<compile_context>
chip_gen: v7x
topology: tpu7x:2x2x1
jax: 0.10.0
libtpu: 0.0.40
codegen_flags: <defaults>
</compile_context>

<pallas_src>
import jax
import jax.numpy as jnp
from jax.experimental import pallas as pl
from jax.experimental.pallas import tpu as pltpu

NUM_HEADS = 12
HEAD_DIM = 64
HIDDEN = NUM_HEADS * HEAD_DIM  # 768


def _hbm_copy_kernel(x_ref, o_ref, sem):
    # Single direct HBM -> HBM DMA (no VMEM staging).
    cp = pltpu.make_async_copy(x_ref, o_ref, sem)
    cp.start()
    cp.wait()


def m_forward(x500, x498):
    """Mirror of M.forward: x500 is a python tuple (shape prefix), x498 a [B,S,H] array."""
    # x501 = operator.add(x500, (12, 64))  -- host-side tuple concat.
    x501 = tuple(x500) + (NUM_HEADS, HEAD_DIM)

    B, S, H = x498.shape
    assert H == HIDDEN and (B, S) == tuple(x500)

    # Lane-dense 2-D slab; contiguous reshape is metadata-only.
    x2d = x498.reshape(B * S, H)

    out2d = pl.pallas_call(
        _hbm_copy_kernel,
        out_shape=jax.ShapeDtypeStruct((B * S, H), x498.dtype),
        in_specs=[pl.BlockSpec(memory_space=pl.ANY)],   # raw HBM ref, no auto-DMA
        out_specs=pl.BlockSpec(memory_space=pl.ANY),    # raw HBM ref, no auto-DMA
        scratch_shapes=[pltpu.SemaphoreType.DMA(())],
    )(x2d)

    # The actual "view": contiguous head split, free metadata reshape in XLA.
    return out2d.reshape(x501)


if __name__ == "__main__":
    key = jax.random.PRNGKey(0)
    # Shapes implied by the module: x498 is [1, 384, 768], x500 = (1, 384).
    x498 = jax.random.normal(key, (1, 384, 768), dtype=jnp.float32)
    x500 = (1, 384)

    x502 = m_forward(x500, x498)
    jax.block_until_ready(x502)

    # Correctness check against the pure-JAX reference (view == contiguous reshape).
    ref = x498.reshape((1, 384, NUM_HEADS, HEAD_DIM))
    assert x502.shape == (1, 384, 12, 64)
    assert x502.dtype == x498.dtype
    assert bool(jnp.array_equal(x502, ref))

    print("KERNEL_OK")
</pallas_src>

<mosaic_0001>
module attributes {stable_mosaic.version = 11 : i64} {
  func.func @_hbm_copy_kernel(%arg0: memref<384x768xf32, #tpu.memory_space<any>>, %arg1: memref<384x768xf32, #tpu.memory_space<any>>, %arg2: memref<!tpu.dma_semaphore, #tpu.memory_space<semaphore_mem>>) attributes {dimension_semantics = [], scalar_prefetch = 0 : i64, scratch_operands = 1 : i64, tpu.core_type = #tpu.core_type<tc>} {
    tpu.enqueue_dma source(%arg0 : memref<384x768xf32, #tpu.memory_space<any>>) target(%arg1 : memref<384x768xf32, #tpu.memory_space<any>>) target_semaphore(%arg2 : memref<!tpu.dma_semaphore, #tpu.memory_space<semaphore_mem>>)
    tpu.wait_dma2 semaphore(%arg2 : memref<!tpu.dma_semaphore, #tpu.memory_space<semaphore_mem>>) src(%arg0 : memref<384x768xf32, #tpu.memory_space<any>>) dst(%arg1 : memref<384x768xf32, #tpu.memory_space<any>>)
    return
  }
}

</mosaic_0001>

<bundles_post_ra>
// kernel: tpu_custom_call.1
= control target key start
LH: loop header
LB: loop body
LE: loop exit
PB: predicated region body
PF: predicated region fallthrough
CT: control target
= control target key end

     0   :  { %s35_s6 = smov [#allocation2]   ;;  %s36_s7 = smov [#allocation3]   ;;  %s54_s0 = inlined_call_operand.hbm [shape: f32[384,768], index: 0, kind: input, shape index: {}]   ;;  %s55_s1 = inlined_call_operand.hbm [shape: f32[384,768], index: 1, kind: output, shape index: {}]  }
   0x1   :  { %s37_s8 = smov 0  }
   0x2   :  { %18 = dma.general %s54_s0, 36864, %s55_s1, %s35_s6, %s36_s7, [#allocation4], %s37_s8, 0  }
   0x3   :  { %33 = dma.done.wait [#allocation2], 36864 }
   0x4   :  { %34 = vsyncadd [#allocation2], 4294930432 }
   0x5   :  { %23 = vsyncmov [#allocation2] }
   0x8   :  { %s24_s13 = vpop.sfrf %23 }
   0x9   :  { %p29_p0 = scmp.ne.s32.totalorder %s24_s13, 0 }
   0xb   :  { %28 = shalt.err (%p29_p0)  }

</bundles_post_ra>
